<compile_context>
chip_gen: v7x
topology: tpu7x:2x2x1
jax: 0.10.0
libtpu: 0.0.40
codegen_flags: <defaults>
</compile_context>

<pallas_src>
import math

import jax
import jax.numpy as jnp
from jax import lax
from jax.experimental import pallas as pl
from jax.experimental.pallas import tpu as pltpu


def dqn_kernel(x_ref, p1_ref, p2_ref, p3_ref, out_ref):
    """Fused 3-layer MLP in a (features x batch) orientation (batch rides the lane axis).

    x_ref  : (tb, S)        state tile, bf16
    p1_ref : (D1, S + 1)    [W1^T | b1] packed, bf16 (last column is the bias)
    p2_ref : (D2, D1 + 1)   [W2^T | b2] packed, bf16
    p3_ref : (A,  D2 + 1)   [W3^T | b3] packed, bf16
    out_ref: (A, tb)        Q-values, f32, batch on lanes (lane-dense, minimal bytes)
    """
    s = p1_ref.shape[1] - 1
    d1 = p2_ref.shape[1] - 1
    d2 = p3_ref.shape[1] - 1

    x = x_ref[...]                                            # (tb, S) bf16

    # layer_1: (D1, S) . (tb, S)^T -> (D1, tb). Contract x's feature axis so batch -> lanes.
    h1 = lax.dot_general(
        p1_ref[:, :s], x, (((1,), (1,)), ((), ())),
        preferred_element_type=jnp.float32)
    h1 = jnp.maximum(h1 + p1_ref[:, s:s + 1].astype(jnp.float32), 0.0)   # bias/ReLU in f32

    # layer_2: (D2, D1) @ (D1, tb) -> (D2, tb)
    h2 = lax.dot_general(
        p2_ref[:, :d1], h1.astype(jnp.bfloat16), (((1,), (0,)), ((), ())),
        preferred_element_type=jnp.float32)
    h2 = jnp.maximum(h2 + p2_ref[:, d1:d1 + 1].astype(jnp.float32), 0.0)

    # layer_3: (A, D2) @ (D2, tb) -> (A, tb); no activation.
    out_ref[...] = (
        lax.dot_general(
            p3_ref[:, :d2], h2.astype(jnp.bfloat16), (((1,), (0,)), ((), ())),
            preferred_element_type=jnp.float32)
        + p3_ref[:, d2:d2 + 1].astype(jnp.float32)
    )


def dqn_forward(state, packed_params, *, block_b=4096):
    """Fused DQN forward. Returns (B, n_actions) f32 Q-values (PyTorch module semantics).

    Small batches run as a single block. Large batches are tiled along the batch axis
    (default 4096 rows/step); the tiny packed weights stay VMEM-resident across grid steps
    and non-divisible batches are zero-padded to a tile multiple in the wrapper (the padded
    rows are sliced off the output), so the pipeline is never dropped.
    """
    p1, p2, p3 = packed_params
    B, S = state.shape
    d1, d2, n_actions = p1.shape[0], p2.shape[0], p3.shape[0]

    # HBM-facing dtype: bf16. No-op if the caller (e.g. the replay buffer) already stores bf16.
    x = state if state.dtype == jnp.bfloat16 else state.astype(jnp.bfloat16)

    if B <= block_b:
        tb, bp = B, B
    else:
        tb = block_b
        bp = ((B + tb - 1) // tb) * tb
        if bp != B:
            x = jnp.pad(x, ((0, bp - B), (0, 0)))
    grid = (bp // tb,)

    flops = 2 * bp * (S * d1 + d1 * d2 + d2 * n_actions)
    bytes_accessed = bp * S * 2 + n_actions * bp * 4 + 2 * (p1.size + p2.size + p3.size)

    out = pl.pallas_call(
        dqn_kernel,
        out_shape=jax.ShapeDtypeStruct((n_actions, bp), jnp.float32),
        grid=grid,
        in_specs=[
            pl.BlockSpec((tb, S), lambda i: (i, 0)),        # batch-tiled state (read)
            pl.BlockSpec(p1.shape, lambda i: (0, 0)),       # resident packed weights
            pl.BlockSpec(p2.shape, lambda i: (0, 0)),
            pl.BlockSpec(p3.shape, lambda i: (0, 0)),
        ],
        out_specs=pl.BlockSpec((n_actions, tb), lambda i: (0, i)),  # batch on lanes (write)
        compiler_params=pltpu.CompilerParams(
            dimension_semantics=("parallel",),
        ),
        cost_estimate=pl.CostEstimate(
            flops=flops, transcendentals=0, bytes_accessed=bytes_accessed),
    )(x, p1, p2, p3)

    # (A, bp) -> (B, A): tiny transpose of the 8-row result; matches the module's output layout.
    return out[:, :B].T


def init_params(key, state_shape, n_dense_1, n_dense_2, action_shape):
    """Deterministic init mimicking PyTorch nn.Linear default:
    U(-1/sqrt(fan_in), 1/sqrt(fan_in)) for weight and bias. Weights are (in, out)."""
    keys = jax.random.split(key, 6)

    def linear(kw, kb, fan_in, fan_out):
        bound = 1.0 / math.sqrt(fan_in)
        w = jax.random.uniform(kw, (fan_in, fan_out), jnp.float32, -bound, bound)
        b = jax.random.uniform(kb, (1, fan_out), jnp.float32, -bound, bound)
        return w, b

    w1, b1 = linear(keys[0], keys[1], state_shape, n_dense_1)
    w2, b2 = linear(keys[2], keys[3], n_dense_1, n_dense_2)
    w3, b3 = linear(keys[4], keys[5], n_dense_2, action_shape)
    return (w1, b1, w2, b2, w3, b3)


def pack_params(params):
    """Pack each layer into one bf16 array [W^T | b^T] of shape (out, in+1) for the
    (features x batch) kernel orientation: rows are output features, last column is the bias.
    No output-column padding: n_actions=8 is already a full sublane tile in this orientation.
    One-time prep, off the forward hot path."""
    w1, b1, w2, b2, w3, b3 = params

    def pack(w, b):
        return jnp.concatenate([w.T, b.T], axis=1).astype(jnp.bfloat16)

    return (pack(w1, b1), pack(w2, b2), pack(w3, b3))


if __name__ == "__main__":
    # Small, module-consistent shapes: 16-dim state, two hidden layers of 32, 8 actions.
    batch = 8
    state_shape = 16
    n_dense_1 = 32
    n_dense_2 = 32
    action_shape = 8

    key = jax.random.PRNGKey(0)
    k_params, k_state, k_big = jax.random.split(key, 3)

    params = init_params(k_params, state_shape, n_dense_1, n_dense_2, action_shape)
    packed = pack_params(params)

    def ref_forward(x):
        # Pure f32 reference (PyTorch-module semantics).
        w1, b1, w2, b2, w3, b3 = params
        h = jnp.maximum(x @ w1 + b1, 0.0)
        h = jnp.maximum(h @ w2 + b2, 0.0)
        return h @ w3 + b3

    def ref_forward_bf16(x):
        # Mirrors the kernel's dtype handling (bf16 matmul operands, f32 accumulation and
        # f32 bias-add/ReLU) -> matches the kernel up to accumulation-order error.
        w1, b1, w2, b2, w3, b3 = params
        up = lambda a: a.astype(jnp.bfloat16).astype(jnp.float32)
        h = jnp.maximum(up(x) @ up(w1) + up(b1), 0.0)
        h = jnp.maximum(up(h) @ up(w2) + up(b2), 0.0)
        return up(h) @ up(w3) + up(b3)

    # Online-inference sized batch (single-block path).
    state = jax.random.normal(k_state, (batch, state_shape), dtype=jnp.float32)
    actions = dqn_forward(state, packed)
    jax.block_until_ready(actions)
    assert actions.shape == (batch, action_shape)
    assert jnp.allclose(actions, ref_forward_bf16(state), atol=1e-2, rtol=1e-2)
    assert jnp.allclose(actions, ref_forward(state), atol=5e-2, rtol=5e-2)

    # Replay-buffer sized batch: exercises the batch-tiled grid (resident weights, "parallel"
    # batch axis across >=2 grid steps for megacore, non-divisible batch padded in the wrapper).
    big_batch = 6000  # deliberately not a multiple of block_b
    big_state = jax.random.normal(k_big, (big_batch, state_shape), dtype=jnp.float32)
    big_actions = dqn_forward(big_state, packed, block_b=2048)
    jax.block_until_ready(big_actions)
    assert big_actions.shape == (big_batch, action_shape)
    assert jnp.allclose(big_actions, ref_forward_bf16(big_state), atol=1e-2, rtol=1e-2)
    assert jnp.allclose(big_actions, ref_forward(big_state), atol=5e-2, rtol=5e-2)

    print("KERNEL_OK")
</pallas_src>

<mosaic_0001>
module attributes {stable_mosaic.version = 11 : i64} {
  func.func @dqn_kernel(%arg0: i32, %arg1: memref<8x16xbf16, #tpu.memory_space<vmem>>, %arg2: memref<32x17xbf16, #tpu.memory_space<vmem>>, %arg3: memref<32x33xbf16, #tpu.memory_space<vmem>>, %arg4: memref<8x33xbf16, #tpu.memory_space<vmem>>, %arg5: memref<8x8xf32, #tpu.memory_space<vmem>>) attributes {dimension_semantics = [#tpu.dimension_semantics<parallel>], iteration_bounds = array<i64: 1>, scalar_prefetch = 0 : i64, scratch_operands = 0 : i64, tpu.core_type = #tpu.core_type<tc>, window_params = [{transform_indices = @transform_0, window_bounds = array<i64: 8, 16>}, {pipeline_mode = #tpu.pipeline_mode<synchronous>, transform_indices = @transform_1, window_bounds = array<i64: 32, 17>}, {pipeline_mode = #tpu.pipeline_mode<synchronous>, transform_indices = @transform_2, window_bounds = array<i64: 32, 33>}, {pipeline_mode = #tpu.pipeline_mode<synchronous>, transform_indices = @transform_3, window_bounds = array<i64: 8, 33>}, {transform_indices = @transform_4, window_bounds = array<i64: 8, 8>}]} {
    %c0 = arith.constant 0 : index
    %c0_0 = arith.constant 0 : index
    %0 = vector.load %arg1[%c0, %c0_0] : memref<8x16xbf16, #tpu.memory_space<vmem>>, vector<8x16xbf16>
    %c0_1 = arith.constant 0 : index
    %c0_2 = arith.constant 0 : index
    %1 = vector.load %arg2[%c0_1, %c0_2] : memref<32x17xbf16, #tpu.memory_space<vmem>>, vector<32x16xbf16>
    %cst = arith.constant dense<0.000000e+00> : vector<32x8xf32>
    %2 = tpu.matmul %1, %0, %cst {dimension_numbers = #tpu.dot_dimension_numbers<[1], [1], [0], [0], [0, 0, 1, 0], [], []>} : vector<32x16xbf16>, vector<8x16xbf16>, vector<32x8xf32> -> vector<32x8xf32>
    %c0_3 = arith.constant 0 : index
    %c16 = arith.constant 16 : index
    %3 = vector.load %arg2[%c0_3, %c16] : memref<32x17xbf16, #tpu.memory_space<vmem>>, vector<32x1xbf16>
    %4 = arith.extf %3 : vector<32x1xbf16> to vector<32x1xf32>
    %5 = vector.broadcast %4 : vector<32x1xf32> to vector<32x8xf32>
    %6 = arith.addf %2, %5 : vector<32x8xf32>
    %cst_4 = arith.constant 0.000000e+00 : f32
    %7 = vector.broadcast %cst_4 : f32 to vector<32x8xf32>
    %8 = arith.maximumf %6, %7 : vector<32x8xf32>
    %c0_5 = arith.constant 0 : index
    %c0_6 = arith.constant 0 : index
    %9 = vector.load %arg3[%c0_5, %c0_6] : memref<32x33xbf16, #tpu.memory_space<vmem>>, vector<32x32xbf16>
    %10 = arith.truncf %8 : vector<32x8xf32> to vector<32x8xbf16>
    %cst_7 = arith.constant dense<0.000000e+00> : vector<32x8xf32>
    %11 = tpu.matmul %9, %10, %cst_7 {dimension_numbers = #tpu.dot_dimension_numbers<[1], [0], [0], [1], [0, 0, 1, 1], [], []>} : vector<32x32xbf16>, vector<32x8xbf16>, vector<32x8xf32> -> vector<32x8xf32>
    %c0_8 = arith.constant 0 : index
    %c32 = arith.constant 32 : index
    %12 = vector.load %arg3[%c0_8, %c32] : memref<32x33xbf16, #tpu.memory_space<vmem>>, vector<32x1xbf16>
    %13 = arith.extf %12 : vector<32x1xbf16> to vector<32x1xf32>
    %14 = vector.broadcast %13 : vector<32x1xf32> to vector<32x8xf32>
    %15 = arith.addf %11, %14 : vector<32x8xf32>
    %cst_9 = arith.constant 0.000000e+00 : f32
    %16 = vector.broadcast %cst_9 : f32 to vector<32x8xf32>
    %17 = arith.maximumf %15, %16 : vector<32x8xf32>
    %c0_10 = arith.constant 0 : index
    %c0_11 = arith.constant 0 : index
    %18 = vector.load %arg4[%c0_10, %c0_11] : memref<8x33xbf16, #tpu.memory_space<vmem>>, vector<8x32xbf16>
    %19 = arith.truncf %17 : vector<32x8xf32> to vector<32x8xbf16>
    %cst_12 = arith.constant dense<0.000000e+00> : vector<8x8xf32>
    %20 = tpu.matmul %18, %19, %cst_12 {dimension_numbers = #tpu.dot_dimension_numbers<[1], [0], [0], [1], [0, 0, 1, 1], [], []>} : vector<8x32xbf16>, vector<32x8xbf16>, vector<8x8xf32> -> vector<8x8xf32>
    %c0_13 = arith.constant 0 : index
    %c32_14 = arith.constant 32 : index
    %21 = vector.load %arg4[%c0_13, %c32_14] : memref<8x33xbf16, #tpu.memory_space<vmem>>, vector<8x1xbf16>
    %22 = arith.extf %21 : vector<8x1xbf16> to vector<8x1xf32>
    %23 = vector.broadcast %22 : vector<8x1xf32> to vector<8x8xf32>
    %24 = arith.addf %20, %23 : vector<8x8xf32>
    %c0_15 = arith.constant 0 : index
    %c0_16 = arith.constant 0 : index
    %25 = vector.load %arg5[%c0_15, %c0_16] : memref<8x8xf32, #tpu.memory_space<vmem>>, vector<8x8xf32>
    tpu.vector_store %arg5[%c0_15, %c0_16], %24 {strides = array<i32>} : memref<8x8xf32, #tpu.memory_space<vmem>>, vector<8x8xf32>,
    return
  }
  func.func @transform_0(%arg0: i32) -> (i32, i32) {
    %c0_i32 = arith.constant 0 : i32
    %c0_i32_0 = arith.constant 0 : i32
    return %arg0, %c0_i32 : i32, i32
  }
  func.func @transform_1(%arg0: i32) -> (i32, i32) {
    %c0_i32 = arith.constant 0 : i32
    %c0_i32_0 = arith.constant 0 : i32
    %c0_i32_1 = arith.constant 0 : i32
    return %c0_i32, %c0_i32_0 : i32, i32
  }
  func.func @transform_2(%arg0: i32) -> (i32, i32) {
    %c0_i32 = arith.constant 0 : i32
    %c0_i32_0 = arith.constant 0 : i32
    %c0_i32_1 = arith.constant 0 : i32
    return %c0_i32, %c0_i32_0 : i32, i32
  }
  func.func @transform_3(%arg0: i32) -> (i32, i32) {
    %c0_i32 = arith.constant 0 : i32
    %c0_i32_0 = arith.constant 0 : i32
    %c0_i32_1 = arith.constant 0 : i32
    return %c0_i32, %c0_i32_0 : i32, i32
  }
  func.func @transform_4(%arg0: i32) -> (i32, i32) {
    %c0_i32 = arith.constant 0 : i32
    %c0_i32_0 = arith.constant 0 : i32
    return %c0_i32, %arg0 : i32, i32
  }
}

</mosaic_0001>

<bundles_post_ra>
// kernel: tpu_custom_call.1
= control target key start
LH: loop header
LB: loop body
LE: loop exit
PB: predicated region body
PF: predicated region fallthrough
CT: control target
= control target key end

     0   :  { %vm58_vm0 = vcmask 130048   ;;  %v399_v4 = vmov 16   ;;  %s466_s0 = inlined_call_operand.vmem [shape: bf16[8,16], index: 0, kind: input, shape index: {}]   ;;  %s467_s1 = inlined_call_operand.vmem [shape: bf16[32,17], index: 1, kind: input, shape index: {}]   ;;  %s468_s2 = inlined_call_operand.vmem [shape: bf16[32,33], index: 2, kind: input, shape index: {}]   ;;  %s469_s3 = inlined_call_operand.vmem [shape: bf16[8,33], index: 3, kind: input, shape index: {}]   ;;  %s470_s4 = inlined_call_operand.hbm [shape: f32[8,8], index: 4, kind: output, shape index: {}]  }
   0x1   :  { %v19_v0 = vld [vmem:[%s466_s0] sm:$0xf]  ;;  %v22_v3 = vld [vmem:[%s467_s1 + $0x8] sm:$0xff]   ;;  %336 = vset.pattern.permute.xlu0 %v399_v4 }
   0x2   :  { %v20_v1 = vld [vmem:[%s467_s1] sm:$0xff]   ;;  %330 = vmatprep.subr.msk.bf16.mxu0 %vm58_vm0, %v19_v0  ;;  %v66_v2 = vsel %vm58_vm0, %v19_v0, 0 }
   0x3   :  { %v24_v5 = vunpack.c.l.bf16 %v20_v1 }
   0x4   :  { %9 = vsyncpa [#allocation3], 0  ;;  %309 = vmatpush3.bf16.xpose.msra.mxu0 %v66_v2  ;;  %v25_v6 = vunpack.c.h.bf16 %v20_v1  ;;  %v26_v7 = vunpack.c.l.bf16 %v22_v3  ;;  %v27_v8 = vunpack.c.h.bf16 %v22_v3  ;;  %310 = vmatprep.mubr.msk.bf16.mxu0 %vm58_vm0, %v20_v1  ;;  %v121_v11 = vld [vmem:[%s468_s2] sm:$0xff]   ;;  %vm161_vm1 = vcmask 261120   ;;  %v123_v12 = vld [vmem:[%s468_s2 + $0x8] sm:$0xff]  }
   0x5   :  { %318 = vmatprep.mubr.msk.bf16.mxu1 %vm161_vm1, %v121_v11  ;;  %v127_v13 = vunpack.c.l.bf16 %v121_v11  ;;  %v128_v14 = vunpack.c.h.bf16 %v121_v11  ;;  %v129_v15 = vunpack.c.l.bf16 %v123_v12  ;;  %v400_v16 = vmov 32   ;;  %v221_v37 = vld [vmem:[%s469_s3] sm:$0xf]  ;;  %s403_s3 = smov [#allocation2]  }
   0x6   :  { %v337_v9 = vpack.i.bf16 %v25_v6, %v24_v5  ;;  %v342_v10 = vpack.i.bf16 %v27_v8, %v26_v7  ;;  %347 = vset.pattern.permute.xlu1 %v400_v16  ;;  %v130_v17 = vunpack.c.h.bf16 %v123_v12  ;;  %v401_v36 = vmov 0.0   ;;  %s281_s24 = sshll.u32 %s403_s3, 4  ;;  %s282_s24 = int_to_ptr.vmem [resolvable:$true] %s281_s24 }
   0x7   :  { %v348_v18 = vpack.i.bf16 %v128_v14, %v127_v13  ;;  %322 = vmatprep.subr.bf16.mxu0 %v401_v36  ;;  %vm402_vm2 = vmmov 0   ;;  %v224_v38 = vunpack.c.l.bf16 %v221_v37  ;;  %vm273_vm3 = vcmask 64512   ;;  %s375_s25 = scalar_lea.vmem %s282_s24, 128  ;;  %p380_p1 = scmp.lt.s32.totalorder %s282_s24, %s282_s24 }
   0x8   :  { %338 = vperm.xlu0 %336, %v337_v9   ;;  %v353_v19 = vpack.i.bf16 %v130_v17, %v129_v15  ;;  %p376_p0 = scmp.ne.s32.totalorder %s282_s24, %s375_s25  ;;  %p381_p2 = scmp.lt.s32.totalorder %s375_s25, %s375_s25 }
   0x9   :  { %349 = vperm.xlu1 %347, %v348_v18  }
   0xa   :  { %p382_p3 = por %p381_p2, %p380_p1 }
   0xb   :  { %311 = vmatmul.mubr.msk.bf16.vlgmr.msra.gmra.mrb[0].mxu0 %vm58_vm0, %v22_v3 }
   0xc   :  { %343 = vperm.xlu0 %336, %v342_v10   ;;  %326 = vmatprep.mubr.msk.bf16.mxu0 %vm402_vm2, %v401_v36  ;;  %p383_p4 = pnand %p382_p3, %p376_p0 }
   0xd   :  { %354 = vperm.xlu1 %347, %v353_v19  }
  0x10   :  { %358 = vset.pattern.permute.xlu0 %v400_v16 }
  0x11   :  { %227 = vperm.xlu0 %358, %v224_v38  }
  0x87   :  { %v339_v20 = vpop.permute.xlu0 %338 }
  0x88   :  { %v350_v39 = vpop.permute.xlu1 %349 }
  0x8b   :  { %v344_v21 = vpop.permute.xlu0 %343 }
  0x8c   :  { %v355_v40 = vpop.permute.xlu1 %354 }
  0x90   :  { %v228_v55 = vpop.permute.xlu0 %227 }
  0xde   :  { %v312_v22 = vpop.f32.mrb[0].mxu0 }
  0xdf   :  { %v367_v23 = vadd.low.f32.bf16 %v312_v22, %v344_v21  ;;  %v102_v24 = vpop.f32.mrb[1].mxu0 }
  0xe0   :  { %v368_v25 = vadd.low.f32.bf16 %v102_v24, %v339_v20  ;;  %v313_v26 = vpop.f32.mrb[2].mxu0 }
  0xe1   :  { %v369_v27 = vadd.high.f32.bf16 %v313_v26, %v344_v21  ;;  %v105_v28 = vpop.f32.mrb[3].mxu0  ;;  %v119_v30 = vmax.f32 %v367_v23, 0.0 }
  0xe2   :  { %v370_v29 = vadd.high.f32.bf16 %v105_v28, %v339_v20  ;;  %v117_v32 = vmax.f32 %v368_v25, 0.0 }
  0xe3   :  { %v120_v31 = vmax.f32 %v369_v27, 0.0 }
  0xe4   :  { %v118_v33 = vmax.f32 %v370_v29, 0.0 }
  0xe5   :  { %v126_v34 = vpack.c.bf16 %v120_v31, %v119_v30 }
  0xe6   :  { %v125_v35 = vpack.c.bf16 %v118_v33, %v117_v32 }
  0xe8   :  { %314 = vmatprep.subr.bf16.mxu1 %v125_v35 }
  0xe9   :  { %315 = vmatpush3.bf16.msra.mxu1 %v125_v35 }
  0xea   :  { %316 = vmatprep.subr.bf16.mxu1 %v126_v34 }
  0xed   :  { %317 = vmatpush3.bf16.msra.mxu1 %v126_v34 }
  0xf0   :  { %319 = vmatmul.mubr.msk.bf16.vlgmr.msra.gmra.mrb[0].mxu1 %vm161_vm1, %v123_v12 }
 0x1c3   :  { %v320_v41 = vpop.f32.mrb[0].mxu1 }
 0x1c4   :  { %v371_v42 = vadd.low.f32.bf16 %v320_v41, %v355_v40  ;;  %v202_v43 = vpop.f32.mrb[1].mxu1 }
 0x1c5   :  { %v372_v44 = vadd.low.f32.bf16 %v202_v43, %v350_v39  ;;  %v321_v45 = vpop.f32.mrb[2].mxu1 }
 0x1c6   :  { %v373_v46 = vadd.high.f32.bf16 %v321_v45, %v355_v40  ;;  %v205_v47 = vpop.f32.mrb[3].mxu1  ;;  %v219_v49 = vmax.f32 %v371_v42, 0.0 }
 0x1c7   :  { %v374_v48 = vadd.high.f32.bf16 %v205_v47, %v350_v39  ;;  %v217_v51 = vmax.f32 %v372_v44, 0.0 }
 0x1c8   :  { %v220_v50 = vmax.f32 %v373_v46, 0.0 }
 0x1c9   :  { %v218_v52 = vmax.f32 %v374_v48, 0.0 }
 0x1ca   :  { %v223_v53 = vpack.c.bf16 %v220_v50, %v219_v49 }
 0x1cb   :  { %v222_v54 = vpack.c.bf16 %v218_v52, %v217_v51 }
 0x1cd   :  { %323 = vmatpush3.bf16.msra.mxu0 %v222_v54 }
 0x1ce   :  { %324 = vmatprep.subr.bf16.mxu0 %v401_v36 }
 0x1d1   :  { %325 = vmatpush3.bf16.msra.mxu0 %v223_v53 }
 0x1d4   :  { %327 = vmatmul.mubr.msk.bf16.vlgmr.msra.gmra.mrb[4].mxu0 %vm161_vm1, %v221_v37 }
 0x2a7   :  { %v267_v56 = vpop.f32.mrb[4].mxu0 }
 0x2a8   :  { %v268_v57 = vadd.f32 %v267_v56, %v228_v55  ;;  %v328_v58 = vpop.f32.mrb[5].mxu0 }
 0x2a9   :  { %v270_v59 = vpop.f32.mrb[6].mxu0 }
 0x2aa   :  { %v329_v60 = vpop.f32.mrb[7].mxu0  ;;  %274 = vst.msk [vmem:[#allocation2] sm:$0xff] %vm273_vm3, %v268_v57 }
 0x2ab   :  { %386 = shalt.err (!%p383_p4)
}
 0x2ac   :  { %s387_s28 = scalar_lea.hbm %s470_s4, 128 }
 0x2ad   :  { %p388_p5 = scmp.ne.s32.totalorder %s470_s4, %s387_s28  ;;  %p391_p6 = scmp.lt.u32.totalorder %s387_s28, %s470_s4 }
 0x2af   :  { %p393_p7 = pnand %p391_p6, %p388_p5 }
 0x2b1   :  { %396 = shalt.err (!%p393_p7)
}
 0x2b2   :  { %284 = dma.vmem_to_hbm [thread:$0]  %s282_s24, 128, %s470_s4, [#allocation3]  }
 0x2b3   :  { %397 = dma.done.wait [#allocation3], 128  }
 0x2b4   :  { %398 = vsyncadd [#allocation3], 4294967168 }
 0x2b5   :  { %288 = vsyncpa [#allocation3], 1 }

</bundles_post_ra>
